<compile_context>
chip_gen: v6e
topology: v6e:2x2x1
jax: 0.10.0
libtpu: 0.0.40
codegen_flags: <defaults>
</compile_context>

<pallas_src>
import functools

import jax
import jax.numpy as jnp
from jax import lax
from jax.experimental import pallas as pl
from jax.experimental.pallas import tpu as pltpu

MIN_VAR = 0.01
MAX_TILE_B = 512  # rows per grid step; multiple of 8 (sublane), >=256 covers MXU M-dim


def _round_up(n, m):
    return ((n + m - 1) // m) * m


def _prob_vanilla_nn_kernel(x_ref, w1_ref, b1_ref, w2_ref, b2_ref, w3_ref, b3_ref,
                            out_ref, *, out_dim):
    """One batch tile of the MLP: 3 matmuls + relu + restricted-var head."""
    x = x_ref[...]

    h = jnp.dot(x, w1_ref[...], preferred_element_type=jnp.float32) + b1_ref[...]
    h = jnp.maximum(h, 0.0)

    h = jnp.dot(h, w2_ref[...], preferred_element_type=jnp.float32) + b2_ref[...]
    h = jnp.maximum(h, 0.0)

    out = jnp.dot(h, w3_ref[...], preferred_element_type=jnp.float32) + b3_ref[...]

    # Apply the variance transform to the upper half with a lane mask instead of
    # slicing: keeps the store lane-contiguous (one combined write) and avoids
    # cross-lane data movement. Sigmoid on the discarded (mu) lanes is free EUP work.
    col = lax.broadcasted_iota(jnp.int32, out.shape, dimension=1)
    var = MIN_VAR + (0.1 - MIN_VAR) * jax.nn.sigmoid(out)
    combined = jnp.where(col < out_dim, out, var)

    out_ref[...] = combined.astype(out_ref.dtype)


def probabilistic_vanilla_nn(x, params, out_dim):
    """params = (w1, b1, w2, b2, w3, b3); weights already (fan_in, fan_out)."""
    w1, b1, w2, b2, w3, b3 = params
    batch, in_dim = x.shape
    h1 = w1.shape[1]
    h2 = w2.shape[1]
    head = w3.shape[1]  # == 2 * out_dim

    # Pad batch to a sublane multiple, pick the tile, then pad to a tile multiple
    # so the tail grid step never reads/writes out of range.
    padded = _round_up(batch, 8)
    tile_b = min(MAX_TILE_B, padded)
    padded = _round_up(padded, tile_b)
    if padded != batch:
        x = jnp.pad(x, ((0, padded - batch), (0, 0)))

    grid = (padded // tile_b,)

    def resident(shape):
        # Weights/biases: same block every grid step -> stay VMEM-resident,
        # DMA'd from HBM only once.
        return pl.BlockSpec(shape, lambda i: (0, 0))

    cost = pl.CostEstimate(
        flops=2 * padded * (in_dim * h1 + h1 * h2 + h2 * head),
        transcendentals=padded * head,
        bytes_accessed=4 * (padded * (in_dim + head)
                            + in_dim * h1 + h1 + h1 * h2 + h2 + h2 * head + head),
    )

    combined = pl.pallas_call(
        functools.partial(_prob_vanilla_nn_kernel, out_dim=out_dim),
        out_shape=jax.ShapeDtypeStruct((padded, head), jnp.float32),
        grid=grid,
        in_specs=[
            pl.BlockSpec((tile_b, in_dim), lambda i: (i, 0)),
            resident(w1.shape), resident(b1.shape),
            resident(w2.shape), resident(b2.shape),
            resident(w3.shape), resident(b3.shape),
        ],
        out_specs=pl.BlockSpec((tile_b, head), lambda i: (i, 0)),
        compiler_params=pltpu.CompilerParams(dimension_semantics=("parallel",)),
        cost_estimate=cost,
    )(x, w1, b1, w2, b2, w3, b3)

    # Lane-dense combined output; the cheap column split happens in XLA.
    mu = combined[:batch, :out_dim]
    var = combined[:batch, out_dim:]
    return mu, var


def init_params(key, in_dim, hidden_dims, out_dim):
    """Deterministic PyTorch-Linear-style init: U(-1/sqrt(fan_in), 1/sqrt(fan_in)).
    Final layer has 2*out_dim outputs (mu half, raw-var half)."""
    dims = [in_dim] + list(hidden_dims) + [2 * out_dim]
    params = []
    for i in range(len(dims) - 1):
        fan_in, fan_out = dims[i], dims[i + 1]
        key, kw, kb = jax.random.split(key, 3)
        bound = 1.0 / (fan_in ** 0.5)
        w = jax.random.uniform(kw, (fan_in, fan_out), jnp.float32, -bound, bound)
        b = jax.random.uniform(kb, (1, fan_out), jnp.float32, -bound, bound)
        params.extend([w, b])
    return tuple(params)


def reference(x, params, out_dim):
    w1, b1, w2, b2, w3, b3 = params
    h = jnp.maximum(x @ w1 + b1, 0.0)
    h = jnp.maximum(h @ w2 + b2, 0.0)
    out = h @ w3 + b3
    mu = out[:, :out_dim]
    var = MIN_VAR + (0.1 - MIN_VAR) * jax.nn.sigmoid(out[:, out_dim:])
    return mu, var


if __name__ == "__main__":
    in_dim, out_dim = 16, 8
    hidden_dims = [32, 32]

    key = jax.random.PRNGKey(0)
    key, kp = jax.random.split(key)
    params = init_params(kp, in_dim, hidden_dims, out_dim)

    # Small aligned batch.
    key, kx = jax.random.split(key)
    x = jax.random.normal(kx, (8, in_dim), jnp.float32)
    mu, var = probabilistic_vanilla_nn(x, params, out_dim)
    jax.block_until_ready((mu, var))
    mu_ref, var_ref = reference(x, params, out_dim)
    assert mu.shape == (8, out_dim) and var.shape == (8, out_dim)
    assert jnp.allclose(mu, mu_ref, atol=1e-5, rtol=1e-5)
    assert jnp.allclose(var, var_ref, atol=1e-5, rtol=1e-5)
    assert bool(jnp.all(var > MIN_VAR)) and bool(jnp.all(var < 0.1))

    # Ragged batch (exercises the pad-to-tile tail handling).
    key, kx2 = jax.random.split(key)
    x2 = jax.random.normal(kx2, (20, in_dim), jnp.float32)
    mu2, var2 = probabilistic_vanilla_nn(x2, params, out_dim)
    jax.block_until_ready((mu2, var2))
    mu2_ref, var2_ref = reference(x2, params, out_dim)
    assert mu2.shape == (20, out_dim) and var2.shape == (20, out_dim)
    assert jnp.allclose(mu2, mu2_ref, atol=1e-5, rtol=1e-5)
    assert jnp.allclose(var2, var2_ref, atol=1e-5, rtol=1e-5)

    print("KERNEL_OK")
</pallas_src>

<mosaic_0001>
module attributes {stable_mosaic.version = 11 : i64} {
  func.func @_prob_vanilla_nn_kernel(%arg0: i32, %arg1: memref<8x16xf32, #tpu.memory_space<vmem>>, %arg2: memref<16x32xf32, #tpu.memory_space<vmem>>, %arg3: memref<1x32xf32, #tpu.memory_space<vmem>>, %arg4: memref<32x32xf32, #tpu.memory_space<vmem>>, %arg5: memref<1x32xf32, #tpu.memory_space<vmem>>, %arg6: memref<32x16xf32, #tpu.memory_space<vmem>>, %arg7: memref<1x16xf32, #tpu.memory_space<vmem>>, %arg8: memref<8x16xf32, #tpu.memory_space<vmem>>) attributes {dimension_semantics = [#tpu.dimension_semantics<parallel>], iteration_bounds = array<i64: 1>, scalar_prefetch = 0 : i64, scratch_operands = 0 : i64, tpu.core_type = #tpu.core_type<tc>, window_params = [{transform_indices = @transform_0, window_bounds = array<i64: 8, 16>}, {pipeline_mode = #tpu.pipeline_mode<synchronous>, transform_indices = @transform_1, window_bounds = array<i64: 16, 32>}, {pipeline_mode = #tpu.pipeline_mode<synchronous>, transform_indices = @transform_2, window_bounds = array<i64: 1, 32>}, {pipeline_mode = #tpu.pipeline_mode<synchronous>, transform_indices = @transform_3, window_bounds = array<i64: 32, 32>}, {pipeline_mode = #tpu.pipeline_mode<synchronous>, transform_indices = @transform_4, window_bounds = array<i64: 1, 32>}, {pipeline_mode = #tpu.pipeline_mode<synchronous>, transform_indices = @transform_5, window_bounds = array<i64: 32, 16>}, {pipeline_mode = #tpu.pipeline_mode<synchronous>, transform_indices = @transform_6, window_bounds = array<i64: 1, 16>}, {transform_indices = @transform_7, window_bounds = array<i64: 8, 16>}]} {
    %c0 = arith.constant 0 : index
    %c0_0 = arith.constant 0 : index
    %0 = vector.load %arg1[%c0, %c0_0] : memref<8x16xf32, #tpu.memory_space<vmem>>, vector<8x16xf32>
    %c0_1 = arith.constant 0 : index
    %c0_2 = arith.constant 0 : index
    %1 = vector.load %arg2[%c0_1, %c0_2] : memref<16x32xf32, #tpu.memory_space<vmem>>, vector<16x32xf32>
    %cst = arith.constant dense<0.000000e+00> : vector<8x32xf32>
    %2 = tpu.matmul %0, %1, %cst {dimension_numbers = #tpu.dot_dimension_numbers<[1], [0], [0], [1], [0, 0, 1, 1], [], []>} : vector<8x16xf32>, vector<16x32xf32>, vector<8x32xf32> -> vector<8x32xf32>
    %c0_3 = arith.constant 0 : index
    %c0_4 = arith.constant 0 : index
    %3 = vector.load %arg3[%c0_3, %c0_4] : memref<1x32xf32, #tpu.memory_space<vmem>>, vector<1x32xf32>
    %4 = vector.broadcast %3 : vector<1x32xf32> to vector<8x32xf32>
    %5 = arith.addf %2, %4 : vector<8x32xf32>
    %cst_5 = arith.constant 0.000000e+00 : f32
    %6 = vector.broadcast %cst_5 : f32 to vector<8x32xf32>
    %7 = arith.maximumf %5, %6 : vector<8x32xf32>
    %c0_6 = arith.constant 0 : index
    %c0_7 = arith.constant 0 : index
    %8 = vector.load %arg4[%c0_6, %c0_7] : memref<32x32xf32, #tpu.memory_space<vmem>>, vector<32x32xf32>
    %cst_8 = arith.constant dense<0.000000e+00> : vector<8x32xf32>
    %9 = tpu.matmul %7, %8, %cst_8 {dimension_numbers = #tpu.dot_dimension_numbers<[1], [0], [0], [1], [0, 0, 1, 1], [], []>} : vector<8x32xf32>, vector<32x32xf32>, vector<8x32xf32> -> vector<8x32xf32>
    %c0_9 = arith.constant 0 : index
    %c0_10 = arith.constant 0 : index
    %10 = vector.load %arg5[%c0_9, %c0_10] : memref<1x32xf32, #tpu.memory_space<vmem>>, vector<1x32xf32>
    %11 = vector.broadcast %10 : vector<1x32xf32> to vector<8x32xf32>
    %12 = arith.addf %9, %11 : vector<8x32xf32>
    %cst_11 = arith.constant 0.000000e+00 : f32
    %13 = vector.broadcast %cst_11 : f32 to vector<8x32xf32>
    %14 = arith.maximumf %12, %13 : vector<8x32xf32>
    %c0_12 = arith.constant 0 : index
    %c0_13 = arith.constant 0 : index
    %15 = vector.load %arg6[%c0_12, %c0_13] : memref<32x16xf32, #tpu.memory_space<vmem>>, vector<32x16xf32>
    %cst_14 = arith.constant dense<0.000000e+00> : vector<8x16xf32>
    %16 = tpu.matmul %14, %15, %cst_14 {dimension_numbers = #tpu.dot_dimension_numbers<[1], [0], [0], [1], [0, 0, 1, 1], [], []>} : vector<8x32xf32>, vector<32x16xf32>, vector<8x16xf32> -> vector<8x16xf32>
    %c0_15 = arith.constant 0 : index
    %c0_16 = arith.constant 0 : index
    %17 = vector.load %arg7[%c0_15, %c0_16] : memref<1x16xf32, #tpu.memory_space<vmem>>, vector<1x16xf32>
    %18 = vector.broadcast %17 : vector<1x16xf32> to vector<8x16xf32>
    %19 = arith.addf %16, %18 : vector<8x16xf32>
    %20 = tpu.iota {dimensions = array<i32: 1>} : vector<8x16xi32>
    %21 = arith.negf %19 : vector<8x16xf32>
    %22 = math.exp %21 : vector<8x16xf32>
    %cst_17 = arith.constant 1.000000e+00 : f32
    %23 = vector.broadcast %cst_17 : f32 to vector<8x16xf32>
    %24 = arith.addf %23, %22 : vector<8x16xf32>
    %25 = arith.divf %23, %24 : vector<8x16xf32>
    %cst_18 = arith.constant 9.000000e-02 : f32
    %26 = vector.broadcast %cst_18 : f32 to vector<8x16xf32>
    %27 = arith.mulf %26, %25 : vector<8x16xf32>
    %cst_19 = arith.constant 0.00999999977 : f32
    %28 = vector.broadcast %cst_19 : f32 to vector<8x16xf32>
    %29 = arith.addf %28, %27 : vector<8x16xf32>
    %c8_i32 = arith.constant 8 : i32
    %30 = vector.broadcast %c8_i32 : i32 to vector<8x16xi32>
    %31 = arith.cmpi slt, %20, %30 : vector<8x16xi32>
    %32 = arith.select %31, %19, %29 : vector<8x16xi1>, vector<8x16xf32>
    %c0_20 = arith.constant 0 : index
    %c0_21 = arith.constant 0 : index
    %33 = vector.load %arg8[%c0_20, %c0_21] : memref<8x16xf32, #tpu.memory_space<vmem>>, vector<8x16xf32>
    tpu.vector_store %arg8[%c0_20, %c0_21], %32 {strides = array<i32>} : memref<8x16xf32, #tpu.memory_space<vmem>>, vector<8x16xf32>,
    return
  }
  func.func @transform_0(%arg0: i32) -> (i32, i32) {
    %c0_i32 = arith.constant 0 : i32
    %c0_i32_0 = arith.constant 0 : i32
    return %arg0, %c0_i32 : i32, i32
  }
  func.func @transform_1(%arg0: i32) -> (i32, i32) {
    %c0_i32 = arith.constant 0 : i32
    %c0_i32_0 = arith.constant 0 : i32
    %c0_i32_1 = arith.constant 0 : i32
    return %c0_i32, %c0_i32_0 : i32, i32
  }
  func.func @transform_2(%arg0: i32) -> (i32, i32) {
    %c0_i32 = arith.constant 0 : i32
    %c0_i32_0 = arith.constant 0 : i32
    %c0_i32_1 = arith.constant 0 : i32
    return %c0_i32, %c0_i32_0 : i32, i32
  }
  func.func @transform_3(%arg0: i32) -> (i32, i32) {
    %c0_i32 = arith.constant 0 : i32
    %c0_i32_0 = arith.constant 0 : i32
    %c0_i32_1 = arith.constant 0 : i32
    return %c0_i32, %c0_i32_0 : i32, i32
  }
  func.func @transform_4(%arg0: i32) -> (i32, i32) {
    %c0_i32 = arith.constant 0 : i32
    %c0_i32_0 = arith.constant 0 : i32
    %c0_i32_1 = arith.constant 0 : i32
    return %c0_i32, %c0_i32_0 : i32, i32
  }
  func.func @transform_5(%arg0: i32) -> (i32, i32) {
    %c0_i32 = arith.constant 0 : i32
    %c0_i32_0 = arith.constant 0 : i32
    %c0_i32_1 = arith.constant 0 : i32
    return %c0_i32, %c0_i32_0 : i32, i32
  }
  func.func @transform_6(%arg0: i32) -> (i32, i32) {
    %c0_i32 = arith.constant 0 : i32
    %c0_i32_0 = arith.constant 0 : i32
    %c0_i32_1 = arith.constant 0 : i32
    return %c0_i32, %c0_i32_0 : i32, i32
  }
  func.func @transform_7(%arg0: i32) -> (i32, i32) {
    %c0_i32 = arith.constant 0 : i32
    %c0_i32_0 = arith.constant 0 : i32
    return %arg0, %c0_i32 : i32, i32
  }
}

</mosaic_0001>

<bundles_post_ra>
// kernel: tpu_custom_call.1
= control target key start
LH: loop header
LB: loop body
LE: loop exit
PB: predicated region body
PF: predicated region fallthrough
CT: control target
= control target key end

     0   :  { %12 = vsyncpa [#allocation3], 0  ;;  %s519_s0 = inlined_call_operand.hbm [shape: f32[8,16], index: 0, kind: input, shape index: {}]   ;;  %s520_s1 = inlined_call_operand.vmem [shape: f32[16,32], index: 1, kind: input, shape index: {}]   ;;  %s521_s2 = inlined_call_operand.vmem [shape: f32[1,32], index: 2, kind: input, shape index: {}]   ;;  %s522_s3 = inlined_call_operand.vmem [shape: f32[32,32], index: 3, kind: input, shape index: {}]   ;;  %s523_s4 = inlined_call_operand.vmem [shape: f32[1,32], index: 4, kind: input, shape index: {}]   ;;  %s524_s5 = inlined_call_operand.vmem [shape: f32[32,16], index: 5, kind: input, shape index: {}]   ;;  %s525_s6 = inlined_call_operand.vmem [shape: f32[1,16], index: 6, kind: input, shape index: {}]   ;;  %s526_s7 = inlined_call_operand.hbm [shape: f32[8,16], index: 7, kind: output, shape index: {}]  }
   0x1   :  { %13 = vsyncpa [#allocation4], 0  ;;  %s423_s24 = smov [#allocation2]  }
   0x2   :  { %s20_s25 = sshll.u32 %s423_s24, 4  ;;  %s21_s25 = int_to_ptr.vmem [resolvable:$true] %s20_s25 }
   0x3   :  { %s387_s26 = scalar_lea.vmem %s21_s25, 128  ;;  %p392_p1 = scmp.lt.s32.totalorder %s21_s25, %s21_s25 }
   0x4   :  { %p388_p0 = scmp.ne.s32.totalorder %s21_s25, %s387_s26  ;;  %p393_p2 = scmp.lt.s32.totalorder %s387_s26, %s387_s26 }
   0x6   :  { %p394_p3 = por %p393_p2, %p392_p1 }
   0x8   :  { %p395_p4 = pnand %p394_p3, %p388_p0 }
   0xa   :  { %398 = shalt.err (!%p395_p4)
}
   0xb   :  { %23 = dma.hbm_to_vmem [thread:$0]  %s519_s0, 128, %s21_s25, [#allocation3]  }
   0xc   :  { %419 = dma.done.wait [#allocation3], 128  }
   0xd   :  { %420 = vsyncadd [#allocation3], 4294967168  ;;  %v424_v0 = vmov 0.0   ;;  %vm425_vm0 = vmmov 0   ;;  %v41_v1 = vld [vmem:[%s520_s1 + $0x8] sm:$0xff]  ;;  %v40_v2 = vld [vmem:[%s520_s1] sm:$0xff]  ;;  %v294_v29 = vlaneseq }
   0xe   :  { %342 = vmatprep.subr.mxu0 %v424_v0  ;;  %346 = vmatprep.mubr.msk.f32.mxu0 %vm425_vm0, %v424_v0  ;;  %v39_v3 = vld [vmem:[#allocation2] sm:$0xff]  ;;  %vm49_vm1 = vcmask 130048   ;;  %v127_v4 = vld [vmem:[%s522_s3 + $0x18] sm:$0xff]  ;;  %v126_v5 = vld [vmem:[%s522_s3 + $0x10] sm:$0xff]  ;;  %vm135_vm2 = vcmask 261120  }
   0xf   :  { %349 = vmatprep.subr.mxu1 %v424_v0  ;;  %357 = vmatprep.mubr.msk.f32.mxu1 %vm425_vm0, %v424_v0  ;;  %v125_v6 = vld [vmem:[%s522_s3 + $0x8] sm:$0xff]  ;;  %v124_v7 = vld [vmem:[%s522_s3] sm:$0xff]  ;;  %v213_v8 = vld [vmem:[%s524_s5 + $0x18] sm:$0xff]  ;;  %v295_v30 = vand.u32 127, %v294_v29 }
  0x10   :  { %343 = vmatpush3.msra.mxu0 %v41_v1  ;;  %350 = vmatpush3.msra.mxu1 %v127_v4  ;;  %v322_v9 = vld [vmem:[%s521_s2] ss:$0 sm:$0xff]  ;;  %v212_v14 = vld [vmem:[%s524_s5 + $0x10] sm:$0xff]  ;;  %v211_v15 = vld [vmem:[%s524_s5 + $0x8] sm:$0xff] }
  0x11   :  { %344 = vmatprep.subr.mxu0 %v424_v0  ;;  %351 = vmatprep.subr.mxu1 %v424_v0  ;;  %v210_v16 = vld [vmem:[%s524_s5] sm:$0xff]  ;;  %vm304_vm3 = vcmp.lt.s32.totalorder %v295_v30, 8 }
  0x12   :  { %345 = vmatpush3.msra.mxu0 %v40_v2  ;;  %352 = vmatpush3.msra.mxu1 %v126_v5  ;;  %v324_v17 = vld [vmem:[%s523_s4] ss:$0 sm:$0xff]  ;;  %s426_s4 = smov [#allocation5]  }
  0x13   :  { %347 = vmatmul.mubr.msk.f32.vlgmr.msra.gmra.mxu0 %vm49_vm1, %v39_v3  ;;  %360 = vmatprep.subr.mxu0 %v424_v0  ;;  %v326_v22 = vld [vmem:[%s525_s6] ss:$0 sm:$0xff]  ;;  %s313_s5 = sshll.u32 %s426_s4, 4  ;;  %s314_s5 = int_to_ptr.vmem [resolvable:$true] %s313_s5 }
  0x14   :  { %368 = vmatprep.mubr.msk.f32.mxu0 %vm425_vm0, %v424_v0  ;;  %353 = vmatprep.subr.mxu1 %v424_v0  ;;  %s399_s6 = scalar_lea.vmem %s314_s5, 128  ;;  %p404_p6 = scmp.lt.s32.totalorder %s314_s5, %s314_s5 }
  0x15   :  { %354 = vmatpush3.msra.mxu1 %v125_v6  ;;  %361 = vmatpush3.msra.mxu0 %v213_v8  ;;  %p400_p5 = scmp.ne.s32.totalorder %s314_s5, %s399_s6  ;;  %p405_p7 = scmp.lt.s32.totalorder %s399_s6, %s399_s6 }
  0x16   :  { %355 = vmatprep.subr.mxu1 %v424_v0  ;;  %362 = vmatprep.subr.mxu0 %v424_v0 }
  0x17   :  { %356 = vmatpush3.msra.mxu1 %v124_v7  ;;  %363 = vmatpush3.msra.mxu0 %v212_v14  ;;  %p406_p8 = por %p405_p7, %p404_p6 }
  0x18   :  { %364 = vmatprep.subr.mxu0 %v424_v0 }
  0x19   :  { %365 = vmatpush3.msra.mxu0 %v211_v15  ;;  %p407_p9 = pnand %p406_p8, %p400_p5 }
  0x1a   :  { %366 = vmatprep.subr.mxu0 %v424_v0 }
  0x1b   :  { %367 = vmatpush3.msra.mxu0 %v210_v16 }
  0xd3   :  { %v119_v10 = vpop.f32.mrf.mxu0 }
  0xd4   :  { %v120_v11 = vadd.f32 %v322_v9, %v119_v10 }
  0xd5   :  { %v348_v12 = vpop.f32.mrf.mxu0 }
  0xd6   :  { %v123_v13 = vmax.f32 %v120_v11, 0.0 }
  0xd8   :  { %358 = vmatmul.mubr.msk.f32.vlgmr.msra.gmra.mxu1 %vm135_vm2, %v123_v13 }
 0x198   :  { %v205_v18 = vpop.f32.mrf.mxu1 }
 0x199   :  { %v206_v19 = vadd.f32 %v324_v17, %v205_v18 }
 0x19a   :  { %v359_v20 = vpop.f32.mrf.mxu1 }
 0x19b   :  { %v209_v21 = vmax.f32 %v206_v19, 0.0 }
 0x19d   :  { %369 = vmatmul.mubr.msk.f32.vlgmr.msra.gmra.mxu0 %vm135_vm2, %v209_v21 }
 0x25d   :  { %v290_v23 = vpop.f32.mrf.mxu0 }
 0x25e   :  { %v291_v24 = vadd.f32 %v326_v22, %v290_v23 }
 0x25f   :  { %v370_v25 = vpop.f32.mrf.mxu0 }
 0x260   :  { %v328_v26 = vmul.f32 -1.442695, %v291_v24 }
 0x262   :  { %375 = vpow2.f32 %v328_v26 }
 0x26f   :  { %v376_v27 = vpop.eup %375 }
 0x270   :  { %v299_v28 = vadd.f32 1.0, %v376_v27 }
 0x272   :  { %377 = vrcp.f32 %v299_v28 }
 0x27f   :  { %v378_v31 = vpop.eup %377 }
 0x280   :  { %v302_v32 = vmul.f32 0.09, %v378_v31 }
 0x282   :  { %v303_v33 = vadd.f32 0.01, %v302_v32 }
 0x284   :  { %v305_v34 = vsel %vm304_vm3, %v291_v24, %v303_v33 }
 0x285   :  { %306 = vst.msk [vmem:[#allocation5] sm:$0xff] %vm49_vm1, %v305_v34 }
 0x286   :  { %410 = shalt.err (!%p407_p9)
}
 0x287   :  { %316 = dma.vmem_to_hbm [thread:$0]  %s314_s5, 128, %s526_s7, [#allocation4]  }
 0x288   :  { %421 = dma.done.wait [#allocation4], 128  }
 0x289   :  { %422 = vsyncadd [#allocation4], 4294967168 }
 0x28a   :  { %320 = vsyncpa [#allocation3], 1 }
 0x28b   :  { %321 = vsyncpa [#allocation4], 1 }

</bundles_post_ra>
